<compile_context>
chip_gen: v7x
topology: tpu7x:2x2x1
jax: 0.10.0
libtpu: 0.0.40
codegen_flags: <defaults>
</compile_context>

<pallas_src>
import jax
import jax.numpy as jnp
from jax.experimental import pallas as pl
from jax.experimental.pallas import tpu as pltpu


def _copy_kernel(x_ref, o_ref):
    # Pure tile copy: one vld + one vst per vreg, no VALU/XLU/EUP work.
    o_ref[...] = x_ref[...]


# ~4 MiB per block: 1 input + 1 output, each double-buffered -> ~16 MiB VMEM.
_TARGET_BLOCK_BYTES = 4 * 1024 * 1024
# Cap on the lane width of the flattened (rows, lanes) presentation.
_MAX_LANES = 8192


def _pick_lane_width(total: int) -> int:
    """Largest divisor of `total` that is a multiple of 128 and <= _MAX_LANES.

    Falls back to the largest divisor <= _MAX_LANES (full-extent last dim is
    always a legal BlockSpec even when it is not a multiple of 128).
    """
    best_128 = 0
    best_any = 1
    for cand in range(min(_MAX_LANES, total), 0, -1):
        if total % cand:
            continue
        if best_any == 1:
            best_any = cand
        if cand % 128 == 0:
            best_128 = cand
            break
    return best_128 if best_128 else best_any


def _tiled_copy(x2, block_rows, grid_rows):
    M, L = x2.shape
    return pl.pallas_call(
        _copy_kernel,
        out_shape=jax.ShapeDtypeStruct((M, L), x2.dtype),
        grid=(grid_rows,),
        in_specs=[pl.BlockSpec((block_rows, L), lambda i: (i, 0))],
        out_specs=pl.BlockSpec((block_rows, L), lambda i: (i, 0)),
        # Output aliases the input HBM buffer: no second HBM allocation and
        # values-identical write-back, so in-place is race-free.
        input_output_aliases={0: 0},
        compiler_params=pltpu.CompilerParams(
            # v7x: shard the row blocks across both TensorCores.
            dimension_semantics=("parallel",),
        ),
    )(x2)


@jax.jit
def identity(x: jax.Array) -> jax.Array:
    """Identity forward pass: returns x unchanged (same shape, same dtype)."""
    orig_shape = x.shape
    total = int(x.size)

    if total == 0:
        # Nothing to copy; module semantics are simply `return x`.
        return x

    lanes = _pick_lane_width(total)
    M = total // lanes
    x2 = x.reshape(M, lanes)

    itemsize = x2.dtype.itemsize
    # Sublane packing granularity: 8 for 4-byte, 16 for 2-byte, 32 for 1-byte.
    sublane = max(8, 32 // max(1, itemsize))
    row_bytes = lanes * itemsize

    block_rows = _TARGET_BLOCK_BYTES // row_bytes
    block_rows = (block_rows // sublane) * sublane
    if block_rows <= 0:
        block_rows = sublane
    block_rows = min(block_rows, M)
    if block_rows != M and block_rows % sublane != 0:
        # Defensive fallback: full-extent row block is always legal.
        block_rows = M

    grid_rows = pl.cdiv(M, block_rows)
    out2 = _tiled_copy(x2, block_rows=block_rows, grid_rows=grid_rows)
    return out2.reshape(orig_shape)


if __name__ == "__main__":
    key = jax.random.PRNGKey(0)
    # Small NCHW-like input consistent with a typical conv-net tensor.
    x = jax.random.normal(key, (2, 4, 16, 16), dtype=jnp.float32)

    y = identity(x)
    jax.block_until_ready(y)

    assert y.shape == x.shape
    assert y.dtype == x.dtype
    assert bool(jnp.all(y == x))

    print("KERNEL_OK")
</pallas_src>

<mosaic_0001>
module attributes {stable_mosaic.version = 11 : i64} {
  func.func @_copy_kernel(%arg0: i32, %arg1: memref<1x2048xf32, #tpu.memory_space<vmem>>, %arg2: memref<1x2048xf32, #tpu.memory_space<vmem>>) attributes {dimension_semantics = [#tpu.dimension_semantics<parallel>], iteration_bounds = array<i64: 1>, scalar_prefetch = 0 : i64, scratch_operands = 0 : i64, tpu.core_type = #tpu.core_type<tc>, window_params = [{transform_indices = @transform_0, window_bounds = array<i64: 1, 2048>}, {transform_indices = @transform_1, window_bounds = array<i64: 1, 2048>}]} {
    %c0 = arith.constant 0 : index
    %c0_0 = arith.constant 0 : index
    %0 = vector.load %arg1[%c0, %c0_0] : memref<1x2048xf32, #tpu.memory_space<vmem>>, vector<1x2048xf32>
    %c0_1 = arith.constant 0 : index
    %c0_2 = arith.constant 0 : index
    %1 = vector.load %arg2[%c0_1, %c0_2] : memref<1x2048xf32, #tpu.memory_space<vmem>>, vector<1x2048xf32>
    tpu.vector_store %arg2[%c0_1, %c0_2], %0 {strides = array<i32>} : memref<1x2048xf32, #tpu.memory_space<vmem>>, vector<1x2048xf32>,
    return
  }
  func.func @transform_0(%arg0: i32) -> (i32, i32) {
    %c0_i32 = arith.constant 0 : i32
    %c0_i32_0 = arith.constant 0 : i32
    return %arg0, %c0_i32 : i32, i32
  }
  func.func @transform_1(%arg0: i32) -> (i32, i32) {
    %c0_i32 = arith.constant 0 : i32
    %c0_i32_0 = arith.constant 0 : i32
    return %arg0, %c0_i32 : i32, i32
  }
}

</mosaic_0001>

<bundles_post_ra>
// kernel: identity.1
= control target key start
LH: loop header
LB: loop body
LE: loop exit
PB: predicated region body
PF: predicated region fallthrough
CT: control target
= control target key end

     0   :  { %s38_s0 = inlined_call_operand.vmem [shape: f32[1,2048], index: 0, kind: input, shape index: {}, may-alias: {0,1}]   ;;  %s39_s1 = inlined_call_operand.vmem [shape: f32[1,2048], index: 1, kind: output, shape index: {}, may-alias: {0,1}]  }
   0x1   :  { %v8_v0 = vld [vmem:[%s38_s0] sm:$0xff]  ;;  %v9_v1 = vld [vmem:[%s38_s0 + $0x8] sm:$0xff] }
   0x2   :  { %10 = vst [vmem:[%s39_s1] sm:$0xff] %v8_v0  ;;  %11 = vst [vmem:[%s39_s1 + $0x8] sm:$0xff] %v9_v1 }

</bundles_post_ra>
